<compile_context>
chip_gen: v6e
topology: v6e:2x2x1
jax: 0.10.0
libtpu: 0.0.40
codegen_flags: <defaults>
</compile_context>

<pallas_src>
import jax
import jax.numpy as jnp
from jax import lax
from jax.experimental import pallas as pl
from jax.experimental.pallas import tpu as pltpu

EPS = 1e-5                      # nn.BatchNorm2d default eps
TILE_BUDGET_BYTES = 6 << 20     # per-tile target (4-8 MiB sweet spot on v6e/v7x)
VMEM_LIMIT_BYTES = 48 << 20     # explicit scoped VMEM: > ~4x tile footprint, < v7x 64 MiB


# ------------------------------------------------------------------ kernels
def _stats_kernel(x_ref, sum_ref, sumsq_ref, acc_sum, acc_sq):
    """Per-row sum / sum-of-squares over the HW (lane) axis.

    x_ref:              (row_tile, hw_tile)  input dtype
    sum_ref, sumsq_ref: (row_tile, 1)        f32, one partial per (row_block, hw_group)
    acc_sum, acc_sq:    (row_tile, 1)        f32 VMEM scratch, resident across the
                                             reduction axis (grid axis 1).
    """
    k = pl.program_id(1)

    @pl.when(k == 0)
    def _():
        acc_sum[...] = jnp.zeros_like(acc_sum)
        acc_sq[...] = jnp.zeros_like(acc_sq)

    x = x_ref[...].astype(jnp.float32)
    acc_sum[...] += jnp.sum(x, axis=1, keepdims=True)
    acc_sq[...] += jnp.sum(x * x, axis=1, keepdims=True)

    @pl.when(k == pl.num_programs(1) - 1)
    def _():
        sum_ref[...] = acc_sum[...]
        sumsq_ref[...] = acc_sq[...]


def _norm_kernel(x_ref, scale_ref, shift_ref, o_ref):
    """y = x * scale + shift; scale/shift broadcast over the HW lane axis."""
    x = x_ref[...].astype(jnp.float32)
    o_ref[...] = (x * scale_ref[...] + shift_ref[...]).astype(o_ref.dtype)


# ------------------------------------------------------------------ tiling helpers
def _divisors(n):
    ds = set()
    i = 1
    while i * i <= n:
        if n % i == 0:
            ds.add(i)
            ds.add(n // i)
        i += 1
    return sorted(ds)


def _choose_tiles(rows, hw, dtype_bytes, budget_bytes=TILE_BUDGET_BYTES):
    """Pick (row_tile, hw_tile) jointly filling the tile budget.

    `rows` is a multiple of 8 and `hw` a multiple of 128 (caller pads), so every
    candidate tile satisfies the (8, 128) layout rule and stores stay unmasked.
    """
    max_elems = max(budget_bytes // dtype_bytes, 8 * 128)
    row_cands = [r for r in _divisors(rows) if r % 8 == 0] or [rows]
    hw_cands = [128 * d for d in _divisors(hw // 128)]
    best_key, best = None, (min(row_cands), 128)
    for r in row_cands:
        for h in hw_cands:
            if r * h > max_elems:
                continue
            key = (r * h, h)   # biggest tile; tie-break on longer (contiguous) hw runs
            if best_key is None or key > best_key:
                best_key, best = key, (r, h)
    return best


# ------------------------------------------------------------------ wrapper
def conditional_norm(x_nchw, label, weight, bias):
    """x_nchw: (N, C, H, W); label: (N, K); weight: (2C, K); bias: (2C,). Returns NCHW."""
    N, C, H, W = x_nchw.shape
    HW = H * W
    rows = N * C
    in_dtype = x_nchw.dtype
    dtype_bytes = x_nchw.dtype.itemsize

    # flatten to (N*C, HW); pad once (zeros) so tiles satisfy the (8,128) layout rule.
    rows_p = ((rows + 7) // 8) * 8
    hw_p = ((HW + 127) // 128) * 128
    x2 = x_nchw.reshape(rows, HW)
    if rows_p != rows or hw_p != HW:
        # padded rows/cols contribute 0 to the sums and are sliced off at the end
        x2 = jnp.pad(x2, ((0, rows_p - rows), (0, hw_p - HW)))

    row_tile, hw_tile = _choose_tiles(rows_p, hw_p, dtype_bytes)
    row_blocks = rows_p // row_tile
    hw_blocks = hw_p // hw_tile

    # split HW into 2 parallel groups when the row axis has a single block so that
    # v7x's second TensorCore gets work in pass 1 (per-group partials, summed in XLA).
    hw_groups = 2 if (row_blocks == 1 and hw_blocks >= 2 and hw_blocks % 2 == 0) else 1
    hw_inner = hw_blocks // hw_groups

    if hw_groups > 1:                        # row_blocks == 1 here
        grid1 = (hw_groups, hw_inner)
        x1_map = lambda g, k: (0, g * hw_inner + k)
        o1_map = lambda g, k: (g, 0, 0)
    else:
        grid1 = (row_blocks, hw_inner)
        x1_map = lambda i, k: (i, k)
        o1_map = lambda i, k: (0, i, 0)

    # ---- pass 1: per-row sum / sumsq (reduction axis last) ----
    stat_shape = jax.ShapeDtypeStruct((hw_groups, rows_p, 1), jnp.float32)
    psum, psumsq = pl.pallas_call(
        _stats_kernel,
        out_shape=(stat_shape, stat_shape),
        grid_spec=pltpu.PrefetchScalarGridSpec(
            num_scalar_prefetch=0,
            grid=grid1,
            in_specs=[pl.BlockSpec((row_tile, hw_tile), x1_map)],
            out_specs=[pl.BlockSpec((None, row_tile, 1), o1_map),
                       pl.BlockSpec((None, row_tile, 1), o1_map)],
            scratch_shapes=[pltpu.VMEM((row_tile, 1), jnp.float32)] * 2,
        ),
        compiler_params=pltpu.CompilerParams(
            dimension_semantics=("parallel", "arbitrary"),
            vmem_limit_bytes=VMEM_LIMIT_BYTES),
        cost_estimate=pl.CostEstimate(
            flops=3 * rows_p * hw_p,
            transcendentals=0,
            bytes_accessed=rows_p * hw_p * dtype_bytes + 2 * hw_groups * rows_p * 4),
    )(x2)

    # ---- XLA glue: finalize stats, fold BN + conditional affine into scale/shift ----
    count = jnp.float32(N * HW)
    row_sum = jnp.sum(psum[:, :rows, 0], axis=0)        # (N*C,)
    row_sumsq = jnp.sum(psumsq[:, :rows, 0], axis=0)    # (N*C,)
    ch_sum = row_sum.reshape(N, C).sum(axis=0)          # (C,)
    ch_sumsq = row_sumsq.reshape(N, C).sum(axis=0)      # (C,)
    mean = ch_sum / count
    # single-pass variance (E[x^2] - mean^2) keeps the 2-read HBM floor; partials are
    # f32 and the result is clamped, but strongly off-center data could still cancel.
    var = jnp.maximum(ch_sumsq / count - mean * mean, 0.0)   # biased (training-mode BN)
    inv = lax.rsqrt(var + EPS)                               # (C,)

    # tiny embed matmul stays in XLA (hoisted out of the kernels)
    emb = (label.astype(jnp.float32) @ weight.astype(jnp.float32).T
           + bias.astype(jnp.float32))                       # (N, 2C)
    gamma, beta = emb[:, :C], emb[:, C:]
    scale = (gamma * inv[None, :]).reshape(rows)             # (N*C,)
    shift = (beta - gamma * inv[None, :] * mean[None, :]).reshape(rows)
    if rows_p != rows:
        scale = jnp.pad(scale, (0, rows_p - rows))
        shift = jnp.pad(shift, (0, rows_p - rows))
    scale2 = scale[:, None]                                  # (rows_p, 1) f32
    shift2 = shift[:, None]

    # ---- pass 2: y = x * scale + shift, fully parallel, lane-dense stores ----
    if hw_blocks >= row_blocks:   # lead with the wider parallel axis (v7x megacore)
        grid2 = (hw_blocks, row_blocks)
        x2_map = lambda j, i: (i, j)
        s2_map = lambda j, i: (i, 0)
    else:
        grid2 = (row_blocks, hw_blocks)
        x2_map = lambda i, j: (i, j)
        s2_map = lambda i, j: (i, 0)

    out2 = pl.pallas_call(
        _norm_kernel,
        out_shape=jax.ShapeDtypeStruct((rows_p, hw_p), in_dtype),
        grid_spec=pltpu.PrefetchScalarGridSpec(
            num_scalar_prefetch=0,
            grid=grid2,
            in_specs=[pl.BlockSpec((row_tile, hw_tile), x2_map),
                      pl.BlockSpec((row_tile, 1), s2_map),
                      pl.BlockSpec((row_tile, 1), s2_map)],
            out_specs=pl.BlockSpec((row_tile, hw_tile), x2_map),
        ),
        compiler_params=pltpu.CompilerParams(
            dimension_semantics=("parallel", "parallel"),
            vmem_limit_bytes=VMEM_LIMIT_BYTES),
        cost_estimate=pl.CostEstimate(
            flops=2 * rows_p * hw_p,
            transcendentals=0,
            bytes_accessed=2 * rows_p * hw_p * dtype_bytes + 2 * rows_p * 4),
    )(x2, scale2, shift2)

    out = out2
    if rows_p != rows or hw_p != HW:
        out = out[:rows, :HW]
    return out.reshape(N, C, H, W)


# ------------------------------------------------------------------ reference & test
def reference(x_nchw, label, weight, bias):
    """Pure-JAX reference matching the PyTorch forward (training-mode BN)."""
    C = x_nchw.shape[1]
    x = x_nchw.astype(jnp.float32)
    mean = x.mean(axis=(0, 2, 3), keepdims=True)
    var = x.var(axis=(0, 2, 3), keepdims=True)               # biased
    xn = (x - mean) / jnp.sqrt(var + EPS)
    emb = (label.astype(jnp.float32) @ weight.astype(jnp.float32).T
           + bias.astype(jnp.float32))
    gamma, beta = emb[:, :C], emb[:, C:]
    return gamma[:, :, None, None] * xn + beta[:, :, None, None]


if __name__ == "__main__":
    # Small shapes consistent with the module: N=2, C=4, H=W=16, n_condition=8.
    N, C, H, W, K = 2, 4, 16, 16, 8
    key = jax.random.PRNGKey(0)
    kx, kl, kw, kb = jax.random.split(key, 4)

    x = jax.random.normal(kx, (N, C, H, W), dtype=jnp.float32)    # NCHW like PyTorch
    label = jax.random.normal(kl, (N, K), dtype=jnp.float32)      # condition vector

    # Deterministic parameter init mimicking __init__: embed.weight shape (2C, K),
    # columns [C:] zeroed; small deterministic uniform bias.
    weight = jax.random.normal(kw, (2 * C, K), dtype=jnp.float32)
    weight = weight.at[:, C:].set(0.0)
    bias = jax.random.uniform(kb, (2 * C,), dtype=jnp.float32,
                              minval=-1.0 / jnp.sqrt(K), maxval=1.0 / jnp.sqrt(K))

    out = conditional_norm(x, label, weight, bias)
    out = jax.block_until_ready(out)

    ref = reference(x, label, weight, bias)
    assert out.shape == (N, C, H, W)
    assert jnp.allclose(out, ref, atol=1e-4, rtol=1e-4), "mismatch vs reference"

    # TODO(synk): BatchNorm2d running_mean/running_var buffer updates (a training-time
    # side effect) are not modeled; they do not affect this forward output.
    print("KERNEL_OK")
</pallas_src>

<mosaic_0001>
module attributes {stable_mosaic.version = 11 : i64} {
  func.func @_stats_kernel(%arg0: i32, %arg1: i32, %arg2: memref<8x256xf32, #tpu.memory_space<vmem>>, %arg3: memref<1x8x1xf32, #tpu.memory_space<vmem>>, %arg4: memref<1x8x1xf32, #tpu.memory_space<vmem>>, %arg5: memref<8x1xf32, #tpu.memory_space<vmem>>, %arg6: memref<8x1xf32, #tpu.memory_space<vmem>>) attributes {dimension_semantics = [#tpu.dimension_semantics<parallel>, #tpu.dimension_semantics<arbitrary>], iteration_bounds = array<i64: 1, 1>, scalar_prefetch = 0 : i64, scratch_operands = 2 : i64, tpu.core_type = #tpu.core_type<tc>, window_params = [{transform_indices = @transform_0, window_bounds = array<i64: 8, 256>}, {transform_indices = @transform_1, window_bounds = array<i64: 1, 8, 1>}, {transform_indices = @transform_2, window_bounds = array<i64: 1, 8, 1>}]} {
    %c0_i32 = arith.constant 0 : i32
    %0 = arith.cmpi eq, %arg1, %c0_i32 : i32
    %1 = arith.extui %0 : i1 to i32
    %c0_i32_0 = arith.constant 0 : i32
    %2 = arith.cmpi ne, %1, %c0_i32_0 : i32
    scf.if %2 {
      %cst_13 = arith.constant 0.000000e+00 : f32
      %18 = vector.broadcast %cst_13 : f32 to vector<8x1xf32>
      %c0_14 = arith.constant 0 : index
      %c0_15 = arith.constant 0 : index
      %19 = vector.load %arg5[%c0_14, %c0_15] : memref<8x1xf32, #tpu.memory_space<vmem>>, vector<8x1xf32>
      tpu.vector_store %arg5[%c0_14, %c0_15], %18 {strides = array<i32>} : memref<8x1xf32, #tpu.memory_space<vmem>>, vector<8x1xf32>,
      %cst_16 = arith.constant 0.000000e+00 : f32
      %20 = vector.broadcast %cst_16 : f32 to vector<8x1xf32>
      %c0_17 = arith.constant 0 : index
      %c0_18 = arith.constant 0 : index
      %21 = vector.load %arg6[%c0_17, %c0_18] : memref<8x1xf32, #tpu.memory_space<vmem>>, vector<8x1xf32>
      tpu.vector_store %arg6[%c0_17, %c0_18], %20 {strides = array<i32>} : memref<8x1xf32, #tpu.memory_space<vmem>>, vector<8x1xf32>,
    } else {
    }
    %c0 = arith.constant 0 : index
    %c0_1 = arith.constant 0 : index
    %3 = vector.load %arg2[%c0, %c0_1] : memref<8x256xf32, #tpu.memory_space<vmem>>, vector<8x256xf32>
    %c0_2 = arith.constant 0 : index
    %c0_3 = arith.constant 0 : index
    %4 = vector.load %arg5[%c0_2, %c0_3] : memref<8x1xf32, #tpu.memory_space<vmem>>, vector<8x1xf32>
    %cst = arith.constant dense<0.000000e+00> : vector<8xf32>
    %5 = vector.multi_reduction <add>, %3, %cst [1] : vector<8x256xf32> to vector<8xf32>
    %6 = vector.shape_cast %5 : vector<8xf32> to vector<8x1xf32>
    %7 = arith.addf %4, %6 : vector<8x1xf32>
    %c0_4 = arith.constant 0 : index
    %c0_5 = arith.constant 0 : index
    %8 = vector.load %arg5[%c0_4, %c0_5] : memref<8x1xf32, #tpu.memory_space<vmem>>, vector<8x1xf32>
    tpu.vector_store %arg5[%c0_4, %c0_5], %7 {strides = array<i32>} : memref<8x1xf32, #tpu.memory_space<vmem>>, vector<8x1xf32>,
    %c0_6 = arith.constant 0 : index
    %c0_7 = arith.constant 0 : index
    %9 = vector.load %arg6[%c0_6, %c0_7] : memref<8x1xf32, #tpu.memory_space<vmem>>, vector<8x1xf32>
    %10 = arith.mulf %3, %3 : vector<8x256xf32>
    %cst_8 = arith.constant dense<0.000000e+00> : vector<8xf32>
    %11 = vector.multi_reduction <add>, %10, %cst_8 [1] : vector<8x256xf32> to vector<8xf32>
    %12 = vector.shape_cast %11 : vector<8xf32> to vector<8x1xf32>
    %13 = arith.addf %9, %12 : vector<8x1xf32>
    %c0_9 = arith.constant 0 : index
    %c0_10 = arith.constant 0 : index
    %14 = vector.load %arg6[%c0_9, %c0_10] : memref<8x1xf32, #tpu.memory_space<vmem>>, vector<8x1xf32>
    tpu.vector_store %arg6[%c0_9, %c0_10], %13 {strides = array<i32>} : memref<8x1xf32, #tpu.memory_space<vmem>>, vector<8x1xf32>,
    %c0_i32_11 = arith.constant 0 : i32
    %15 = arith.cmpi eq, %arg1, %c0_i32_11 : i32
    %16 = arith.extui %15 : i1 to i32
    %c0_i32_12 = arith.constant 0 : i32
    %17 = arith.cmpi ne, %16, %c0_i32_12 : i32
    scf.if %17 {
      %c0_13 = arith.constant 0 : index
      %c0_14 = arith.constant 0 : index
      %18 = vector.load %arg5[%c0_13, %c0_14] : memref<8x1xf32, #tpu.memory_space<vmem>>, vector<8x1xf32>
      %c0_15 = arith.constant 0 : index
      %c0_16 = arith.constant 0 : index
      %c0_17 = arith.constant 0 : index
      %19 = vector.load %arg3[%c0_15, %c0_16, %c0_17] : memref<1x8x1xf32, #tpu.memory_space<vmem>>, vector<1x8x1xf32>
      %20 = vector.shape_cast %19 : vector<1x8x1xf32> to vector<8x1xf32>
      %21 = vector.shape_cast %18 : vector<8x1xf32> to vector<1x8x1xf32>
      tpu.vector_store %arg3[%c0_15, %c0_16, %c0_17], %21 {strides = array<i32>} : memref<1x8x1xf32, #tpu.memory_space<vmem>>, vector<1x8x1xf32>,
      %c0_18 = arith.constant 0 : index
      %c0_19 = arith.constant 0 : index
      %22 = vector.load %arg6[%c0_18, %c0_19] : memref<8x1xf32, #tpu.memory_space<vmem>>, vector<8x1xf32>
      %c0_20 = arith.constant 0 : index
      %c0_21 = arith.constant 0 : index
      %c0_22 = arith.constant 0 : index
      %23 = vector.load %arg4[%c0_20, %c0_21, %c0_22] : memref<1x8x1xf32, #tpu.memory_space<vmem>>, vector<1x8x1xf32>
      %24 = vector.shape_cast %23 : vector<1x8x1xf32> to vector<8x1xf32>
      %25 = vector.shape_cast %22 : vector<8x1xf32> to vector<1x8x1xf32>
      tpu.vector_store %arg4[%c0_20, %c0_21, %c0_22], %25 {strides = array<i32>} : memref<1x8x1xf32, #tpu.memory_space<vmem>>, vector<1x8x1xf32>,
    } else {
    }
    return
  }
  func.func @transform_0(%arg0: i32, %arg1: i32) -> (i32, i32) {
    %c0_i32 = arith.constant 0 : i32
    return %arg0, %arg1 : i32, i32
  }
  func.func @transform_1(%arg0: i32, %arg1: i32) -> (i32, i32, i32) {
    %c0_i32 = arith.constant 0 : i32
    %c0_i32_0 = arith.constant 0 : i32
    %c0_i32_1 = arith.constant 0 : i32
    return %c0_i32, %arg0, %c0_i32_0 : i32, i32, i32
  }
  func.func @transform_2(%arg0: i32, %arg1: i32) -> (i32, i32, i32) {
    %c0_i32 = arith.constant 0 : i32
    %c0_i32_0 = arith.constant 0 : i32
    %c0_i32_1 = arith.constant 0 : i32
    return %c0_i32, %arg0, %c0_i32_0 : i32, i32, i32
  }
}

</mosaic_0001>

<bundles_post_ra>
// kernel: tpu_custom_call.1
= control target key start
LH: loop header
LB: loop body
LE: loop exit
PB: predicated region body
PF: predicated region fallthrough
CT: control target
= control target key end

     0   :  { %8 = vsyncpa [#allocation5], 0  ;;  %s86_s9 = smov [#allocation4]   ;;  %s118_s0 = inlined_call_operand.hbm [shape: f32[8,256], index: 0, kind: input, shape index: {}]   ;;  %s119_s1 = inlined_call_operand.vmem [shape: f32[1,8,1], index: 1, kind: output, shape index: {0}]   ;;  %s120_s2 = inlined_call_operand.vmem [shape: f32[1,8,1], index: 2, kind: output, shape index: {1}]  }
   0x1   :  { %s15_s10 = sshll.u32 %s86_s9, 4  ;;  %s16_s10 = int_to_ptr.vmem [resolvable:$true] %s15_s10 }
   0x2   :  { %s72_s11 = scalar_lea.vmem %s16_s10, 256  ;;  %p77_p1 = scmp.lt.s32.totalorder %s16_s10, %s16_s10 }
   0x3   :  { %p73_p0 = scmp.ne.s32.totalorder %s16_s10, %s72_s11  ;;  %p78_p2 = scmp.lt.s32.totalorder %s72_s11, %s72_s11 }
   0x5   :  { %p79_p3 = por %p78_p2, %p77_p1 }
   0x7   :  { %p80_p4 = pnand %p79_p3, %p73_p0 }
   0x9   :  { %83 = shalt.err (!%p80_p4)
}
   0xa   :  { %18 = dma.hbm_to_vmem [thread:$0]  %s118_s0, 256, %s16_s10, [#allocation5]  }
   0xb   :  { %84 = dma.done.wait [#allocation5], 256  }
   0xc   :  { %85 = vsyncadd [#allocation5], 4294967040  ;;  %vm26_vm0 = vcmask 7168   ;;  %v87_v0 = vmov 0.0   ;;  %v29_v1 = vld [vmem:[#allocation4] sm:$0xff]  ;;  %v30_v2 = vld [vmem:[#allocation4 + $0x8] sm:$0xff] }
   0xd   :  { %27 = vst.msk [vmem:[#allocation2] sm:$0xff] %vm26_vm0, %v87_v0  ;;  %28 = vst.msk [vmem:[#allocation3] sm:$0xff] %vm26_vm0, %v87_v0  ;;  %v32_v3 = vadd.f32 %v30_v2, %v29_v1  ;;  %v39_v4 = vmul.f32 %v29_v1, %v29_v1  ;;  %v40_v5 = vmul.f32 %v30_v2, %v30_v2 }
   0xf   :  { %33 = vadd.xlane.f32.xlu0 %v32_v3  ;;  %v41_v6 = vadd.f32 %v40_v5, %v39_v4 }
  0x13   :  { %42 = vadd.xlane.f32.xlu0 %v41_v6 }
  0x14   :  { %v31_v7 = vld [vmem:[#allocation2] sm:$0xff]  ;;  %v38_v10 = vld [vmem:[#allocation3] sm:$0xff] }
  0x98   :  { %v34_v8 = vpop.xlane.xlu0 %33 }
  0x99   :  { %v35_v9 = vadd.f32 %v34_v8, %v31_v7 }
  0x9b   :  { %37 = vst.msk [vmem:[#allocation2] sm:$0xff] %vm26_vm0, %v35_v9 }
  0x9c   :  { %v43_v11 = vpop.xlane.xlu0 %42 }
  0x9d   :  { %v44_v12 = vadd.f32 %v43_v11, %v38_v10 }
  0x9f   :  { %45 = vst.msk [vmem:[#allocation3] sm:$0xff] %vm26_vm0, %v44_v12 }
  0xa2   :  { %v49_v13 = vld [vmem:[#allocation2] sm:$0xff] }
  0xa3   :  { %50 = vst.msk [vmem:[%s119_s1] sm:$0xff] %vm26_vm0, %v49_v13 }
  0xa6   :  { %v51_v14 = vld [vmem:[#allocation3] sm:$0xff] }
  0xa7   :  { %52 = vst.msk [vmem:[%s120_s2] sm:$0xff] %vm26_vm0, %v51_v14 }
  0xa8   :  { %61 = vsyncpa [#allocation5], 1 }

</bundles_post_ra>
